<compile_context>
chip_gen: v6e
topology: v6e:2x2x1
jax: 0.10.0
libtpu: 0.0.40
codegen_flags: <defaults>
</compile_context>

<pallas_src>
import jax
import jax.numpy as jnp
from jax.experimental import pallas as pl
from jax.experimental.pallas import tpu as pltpu


def _make_lambda_kernel(lambd):
    """Build a Pallas kernel body that applies `lambd` elementwise to a tile."""
    def kernel(x_ref, o_ref):
        o_ref[...] = lambd(x_ref[...]).astype(o_ref.dtype)
    return kernel


def _sublane_align(dtype) -> int:
    """Min sublane multiple for a dtype (packed dtypes pack along sublanes)."""
    return {4: 8, 2: 16, 1: 32}.get(jnp.dtype(dtype).itemsize, 8)


class Lambda:
    """JAX/Pallas equivalent of the PyTorch `Lambda` module.

    The supplied callable is applied inside a Pallas TPU kernel. The callable
    must be elementwise (shape-preserving, no cross-element interaction) to be
    executed per-block; otherwise (or for tiny inputs) it falls back to plain
    JAX, which preserves the original module's semantics exactly.
    """

    _LANE = 128
    _LANE_CANDIDATES = (32768, 16384, 8192, 4096, 2048, 1024, 512, 256, 128)
    _TARGET_BLOCK_BYTES = 2 * 1024 * 1024   # ~2 MiB/buffer; x4 w/ dbl-buffered in+out
    _VMEM_LIMIT_BYTES = 32 * 1024 * 1024    # safe on v5e/v6e/v7x

    def __init__(self, lambd, *, elementwise: bool = True,
                 min_pallas_elems: int = 1 << 16):
        self.lambd = lambd
        self.elementwise = elementwise
        self.min_pallas_elems = min_pallas_elems
        self._kernel = _make_lambda_kernel(lambd)
        # One XLA program for the whole pallas path; cache keyed on x's
        # shape/dtype automatically by jit.
        self._forward_pallas = jax.jit(self._pallas_impl)

    # ---- Pallas path (traced under jit; all tiling decisions are static) ----
    def _pallas_impl(self, x: jnp.ndarray) -> jnp.ndarray:
        n = x.size
        out_aval = jax.eval_shape(self.lambd,
                                  jax.ShapeDtypeStruct(x.shape, x.dtype))
        out_dtype = out_aval.dtype

        flat = x.reshape(-1)

        # Widest lane dimension that divides n -> zero-copy reshape and
        # unmasked full-width lane stores.
        lane_w = next((w for w in self._LANE_CANDIDATES if n % w == 0), None)
        padded = False
        if lane_w is None:
            # Ragged size: pad the flat tail up to a multiple of 128.
            # TODO(synk): lambdas that are undefined at 0 (e.g. 1/x) compute
            # garbage in the padding; it is sliced away and never read.
            lane_w = self._LANE
            n_pad = pl.cdiv(n, lane_w) * lane_w
            flat = jnp.pad(flat, (0, n_pad - n))
            padded = True

        rows = flat.size // lane_w
        slab = flat.reshape(rows, lane_w)

        # Block sizing: ~2 MiB per buffer, rows aligned to the dtype sublane.
        itemsize = max(jnp.dtype(x.dtype).itemsize, jnp.dtype(out_dtype).itemsize)
        sub = max(_sublane_align(x.dtype), _sublane_align(out_dtype))
        rows_per_block = max(1, self._TARGET_BLOCK_BYTES // (lane_w * itemsize))
        block_rows = max(sub, (rows_per_block // sub) * sub)
        if block_rows >= rows:
            block_rows = rows          # single full-extent block (always legal)
            grid = (1,)
        else:
            grid = (pl.cdiv(rows, block_rows),)   # last block may be partial

        out = pl.pallas_call(
            self._kernel,
            out_shape=jax.ShapeDtypeStruct((rows, lane_w), out_dtype),
            grid_spec=pltpu.PrefetchScalarGridSpec(
                num_scalar_prefetch=0,
                grid=grid,
                in_specs=[pl.BlockSpec((block_rows, lane_w), lambda i: (i, 0))],
                out_specs=pl.BlockSpec((block_rows, lane_w), lambda i: (i, 0)),
            ),
            compiler_params=pltpu.CompilerParams(
                dimension_semantics=("parallel",),
                vmem_limit_bytes=self._VMEM_LIMIT_BYTES,
            ),
        )(slab)

        out_flat = out.reshape(-1)
        if padded:
            out_flat = out_flat[:n]
        return out_flat.reshape(x.shape)

    # ---- Public forward ----
    def __call__(self, x: jnp.ndarray) -> jnp.ndarray:
        n = x.size
        out_aval = jax.eval_shape(self.lambd,
                                  jax.ShapeDtypeStruct(x.shape, x.dtype))

        # Fallbacks: tiny inputs (launch overhead dominates) or lambdas that
        # change shape / are declared non-elementwise (not block-decomposable).
        # TODO(synk): non-elementwise shape-preserving lambdas (e.g. softmax)
        # would need a lambd-specific kernel; they run in plain JAX here.
        if (not self.elementwise or n == 0 or n < self.min_pallas_elems
                or out_aval.shape != x.shape):
            return self.lambd(x)

        return self._forward_pallas(x)


if __name__ == "__main__":
    key = jax.random.PRNGKey(0)
    k0, k1, k2, k3, k4 = jax.random.split(key, 5)

    # Docstring example: Lambda(lambda x: x + 2). Force the kernel path even
    # for the small demo input via min_pallas_elems=0.
    add_two = Lambda(lambda t: t + 2.0, min_pallas_elems=0)

    # 1) Small NCHW input per the glasses usage.
    x_small = jax.random.normal(k0, (2, 4, 16, 16), dtype=jnp.float32)
    y_small = jax.block_until_ready(add_two(x_small))
    assert y_small.shape == x_small.shape and y_small.dtype == x_small.dtype
    assert jnp.allclose(y_small, x_small + 2.0, atol=1e-6, rtol=1e-6)

    # 2) Larger lane-aligned input -> multi-block grid (exercises pipelining).
    x_big = jax.random.normal(k1, (16, 16, 64, 64), dtype=jnp.float32)
    y_big = jax.block_until_ready(add_two(x_big))
    assert jnp.allclose(y_big, x_big + 2.0, atol=1e-6, rtol=1e-6)

    # 3) Row count not a multiple of block_rows -> partial edge block.
    x_edge = jax.random.normal(k2, (21, 32, 32, 32), dtype=jnp.float32)
    y_edge = jax.block_until_ready(add_two(x_edge))
    assert jnp.allclose(y_edge, x_edge + 2.0, atol=1e-6, rtol=1e-6)

    # 4) Ragged size (not a multiple of 128) -> tail-pad path.
    x_rag = jax.random.normal(k3, (3, 5, 17, 13), dtype=jnp.float32)
    y_rag = jax.block_until_ready(add_two(x_rag))
    assert y_rag.shape == x_rag.shape
    assert jnp.allclose(y_rag, x_rag + 2.0, atol=1e-6, rtol=1e-6)

    # 5) bf16 input -> dtype-aware sublane alignment.
    halve = Lambda(lambda t: t * 0.5, min_pallas_elems=0)
    x_bf16 = jax.random.normal(k4, (4, 8, 16, 32), dtype=jnp.bfloat16)
    y_bf16 = jax.block_until_ready(halve(x_bf16))
    assert y_bf16.dtype == jnp.bfloat16 and y_bf16.shape == x_bf16.shape
    assert jnp.allclose(y_bf16.astype(jnp.float32),
                        (x_bf16 * 0.5).astype(jnp.float32),
                        atol=1e-2, rtol=1e-2)

    print("KERNEL_OK")
</pallas_src>

<mosaic_0001>
module attributes {stable_mosaic.version = 11 : i64} {
  func.func @kernel(%arg0: i32, %arg1: memref<1x2048xf32, #tpu.memory_space<vmem>>, %arg2: memref<1x2048xf32, #tpu.memory_space<vmem>>) attributes {dimension_semantics = [#tpu.dimension_semantics<parallel>], iteration_bounds = array<i64: 1>, scalar_prefetch = 0 : i64, scratch_operands = 0 : i64, tpu.core_type = #tpu.core_type<tc>, window_params = [{transform_indices = @transform_0, window_bounds = array<i64: 1, 2048>}, {transform_indices = @transform_1, window_bounds = array<i64: 1, 2048>}]} {
    %c0 = arith.constant 0 : index
    %c0_0 = arith.constant 0 : index
    %0 = vector.load %arg1[%c0, %c0_0] : memref<1x2048xf32, #tpu.memory_space<vmem>>, vector<1x2048xf32>
    %cst = arith.constant 2.000000e+00 : f32
    %1 = vector.broadcast %cst : f32 to vector<1x2048xf32>
    %2 = arith.addf %0, %1 : vector<1x2048xf32>
    %c0_1 = arith.constant 0 : index
    %c0_2 = arith.constant 0 : index
    %3 = vector.load %arg2[%c0_1, %c0_2] : memref<1x2048xf32, #tpu.memory_space<vmem>>, vector<1x2048xf32>
    tpu.vector_store %arg2[%c0_1, %c0_2], %2 {strides = array<i32>} : memref<1x2048xf32, #tpu.memory_space<vmem>>, vector<1x2048xf32>,
    return
  }
  func.func @transform_0(%arg0: i32) -> (i32, i32) {
    %c0_i32 = arith.constant 0 : i32
    %c0_i32_0 = arith.constant 0 : i32
    return %arg0, %c0_i32 : i32, i32
  }
  func.func @transform_1(%arg0: i32) -> (i32, i32) {
    %c0_i32 = arith.constant 0 : i32
    %c0_i32_0 = arith.constant 0 : i32
    return %arg0, %c0_i32 : i32, i32
  }
}

</mosaic_0001>

<bundles_post_ra>
// kernel: _pallas_impl.1
= control target key start
LH: loop header
LB: loop body
LE: loop exit
PB: predicated region body
PF: predicated region fallthrough
CT: control target
= control target key end

     0   :  { %s40_s0 = inlined_call_operand.vmem [shape: f32[1,2048], index: 0, kind: input, shape index: {}]   ;;  %s41_s1 = inlined_call_operand.vmem [shape: f32[1,2048], index: 1, kind: output, shape index: {}]  }
   0x1   :  { %v8_v0 = vld [vmem:[%s40_s0] sm:$0xff]  ;;  %v9_v1 = vld [vmem:[%s40_s0 + $0x8] sm:$0xff] }
   0x2   :  { %v10_v2 = vadd.f32 2.0, %v8_v0  ;;  %v11_v3 = vadd.f32 2.0, %v9_v1 }
   0x4   :  { %12 = vst [vmem:[%s41_s1] sm:$0xff] %v10_v2  ;;  %13 = vst [vmem:[%s41_s1 + $0x8] sm:$0xff] %v11_v3 }

</bundles_post_ra>
